<compile_context>
chip_gen: v6e
topology: v6e:2x2x1
jax: 0.10.0
libtpu: 0.0.40
codegen_flags: <defaults>
</compile_context>

<pallas_src>
import functools

import jax
import jax.numpy as jnp
from jax.experimental import pallas as pl
from jax.experimental.pallas import tpu as pltpu


# ---------------------------------------------------------------------------
# Kernels (pure jnp/lax bodies -> lower on Mosaic and in interpret mode)
# ---------------------------------------------------------------------------
def _softmax_kernel(x_ref, o_ref):
    # F.softmax(logits, dim=1)   (class axis is last here)
    x = x_ref[...].astype(jnp.float32)
    m = jnp.max(x, axis=-1, keepdims=True)
    e = jnp.exp(x - m)
    s = jnp.sum(e, axis=-1, keepdims=True)
    o_ref[...] = (e / s).astype(o_ref.dtype)


def _gumbel_softmax_soft_kernel(x_ref, g_ref, o_ref, *, inv_tau):
    # F.gumbel_softmax(logits, hard=False, tau=tau); Gumbel noise streamed in.
    y = (x_ref[...].astype(jnp.float32) + g_ref[...].astype(jnp.float32)) * inv_tau
    m = jnp.max(y, axis=-1, keepdims=True)
    e = jnp.exp(y - m)
    s = jnp.sum(e, axis=-1, keepdims=True)
    o_ref[...] = (e / s).astype(o_ref.dtype)


def _categorical_sample_kernel(x_ref, u_ref, o_ref):
    # Forward value of BOTH:
    #   F.gumbel_softmax(logits, hard=True, tau=tau)  (argmax(logits+Gumbel) is
    #                                                  tau-independent), and
    #   OneHotCategorical(logits=logits).sample()
    # Both are one-hot Categorical(softmax(logits)) samples; implemented as
    # inverse-CDF sampling with ONE uniform per row:
    #   e_k = exp(x_k - max), cdf_k = sum_{j<=k} e_j (via a tiny triangular matmul,
    #   MXU is otherwise idle), pick the unique k with cdf_{k-1} <= u*total < cdf_k.
    # Randomness stream differs from PyTorch; the distribution is identical.
    x = x_ref[...].astype(jnp.float32)
    m = jnp.max(x, axis=-1, keepdims=True)
    e = jnp.exp(x - m)                                    # (tb, C), in (0, 1]
    total = jnp.sum(e, axis=-1, keepdims=True)            # (tb, 1), >= 1
    t = u_ref[...].astype(jnp.float32) * total            # (tb, 1), in [0, total)

    C = x.shape[-1]
    row = jax.lax.broadcasted_iota(jnp.int32, (C, C), 0)
    col = jax.lax.broadcasted_iota(jnp.int32, (C, C), 1)
    tri = (row <= col).astype(jnp.float32)                # inclusive upper-triangular
    cdf = jnp.dot(e, tri, preferred_element_type=jnp.float32)   # cdf_k

    hit = (t < cdf) & (t >= cdf - e)                      # exactly one True per row
    o_ref[...] = hit.astype(o_ref.dtype)


# ---------------------------------------------------------------------------
# Tile sizing / VMEM budgeting
# ---------------------------------------------------------------------------
def _vmem_limits():
    """(tile-sizing budget, explicit scoped-VMEM limit) — generation aware."""
    try:
        cap = int(pltpu.get_tpu_info().vmem_capacity_bytes)   # 128 MiB v5e/v6e, 64 MiB v7x
    except Exception:
        cap = 64 * 1024 * 1024                                # conservative fallback
    budget = min(cap // 8, 16 * 1024 * 1024)   # double-buffered working-set target
    limit = min(cap // 2, 32 * 1024 * 1024)    # explicit request (raises v5e's 16 MiB default)
    return budget, limit


def _choose_tb(B, C, bytes_per_elem, vmem_budget_bytes):
    """Row-tile size: large (amortize ~0.35us/step), VMEM-budgeted, but leaving
    >= 4 grid steps when B permits (2 steps per TensorCore on v7x keeps the
    per-core DMA/compute pipeline full; v5e/v6e benefit from the extra steps too)."""
    lane_c = max(((C + 127) // 128) * 128, 128)            # lanes pad to 128
    per_row = lane_c * max(bytes_per_elem, 1) * 2          # all tiled arrays, double-buffered
    tb = vmem_budget_bytes // max(per_row, 1)
    tb = min(tb, 1024)                                     # roofline saturates ~512-1024 rows
    quarter = ((max(pl.cdiv(B, 4), 8) + 7) // 8) * 8       # >= 4 steps when possible
    tb = min(tb, quarter)
    tb = min(tb, ((B + 7) // 8) * 8)                       # never exceed the batch
    tb = max(8, (tb // 8) * 8)                             # sublane-safe
    return int(tb)


# ---------------------------------------------------------------------------
# pallas_call wrapper
# ---------------------------------------------------------------------------
def _row_call(kernel, out_dtype, tb, vmem_limit, *arrays):
    B, C = arrays[0].shape
    in_specs = [pl.BlockSpec((tb, a.shape[1]), lambda i: (i, 0)) for a in arrays]
    out_spec = pl.BlockSpec((tb, C), lambda i: (i, 0))
    return pl.pallas_call(
        kernel,
        out_shape=jax.ShapeDtypeStruct((B, C), out_dtype),
        grid=(pl.cdiv(B, tb),),
        in_specs=in_specs,
        out_specs=out_spec,
        compiler_params=pltpu.CompilerParams(
            dimension_semantics=("parallel",),
            vmem_limit_bytes=int(vmem_limit)),
    )(*arrays)


def categorical_activation(logits, training=True, temperature=None, *,
                           key=None, tb=None, out_dtype=None):
    """Pallas equivalent of CategoricalActivation.forward.

    - temperature is not None & training      -> soft gumbel-softmax
    - temperature is not None & not training  -> hard gumbel-softmax (one-hot forward)
    - temperature is None     & training      -> softmax over the class axis
    - temperature is None     & not training  -> OneHotCategorical(logits).sample()

    One-hot branches default to a bfloat16 output (values are exactly 0/1; halves
    write-back bytes on a memory-bound kernel); pass out_dtype to override.
    """
    logits = jnp.asarray(logits)
    B, C = logits.shape
    budget, vmem_limit = _vmem_limits()

    def _sample_onehot(k):
        assert k is not None, "stochastic branches need a PRNG key"
        out_dt = jnp.dtype(jnp.bfloat16) if out_dtype is None else jnp.dtype(out_dtype)
        u = jax.random.uniform(k, (B, 1), dtype=jnp.float32)
        u = jnp.minimum(u, jnp.float32(1.0 - 1e-6))        # keep threshold strictly < total
        nbytes = logits.dtype.itemsize + out_dt.itemsize   # (B,1) uniform is negligible
        tb_ = tb if tb is not None else _choose_tb(B, C, nbytes, budget)
        return _row_call(_categorical_sample_kernel, out_dt, tb_, vmem_limit, logits, u)

    if temperature is not None:
        if training:
            assert key is not None, "stochastic branches need a PRNG key"
            out_dt = logits.dtype if out_dtype is None else jnp.dtype(out_dtype)
            # TODO(synk): on a TPU-only build, draw this in-kernel with
            # pltpu.prng_random_bits to avoid the logits-sized HBM read (no
            # interpret-mode lowering exists for the hardware PRNG).
            noise = jax.random.gumbel(key, (B, C), dtype=logits.dtype)
            nbytes = (logits.dtype.itemsize + noise.dtype.itemsize
                      + jnp.dtype(out_dt).itemsize)
            tb_ = tb if tb is not None else _choose_tb(B, C, nbytes, budget)
            kern = functools.partial(_gumbel_softmax_soft_kernel,
                                     inv_tau=float(1.0 / float(temperature)))
            return _row_call(kern, out_dt, tb_, vmem_limit, logits, noise)
        else:
            return _sample_onehot(key)
    elif training:
        out_dt = logits.dtype if out_dtype is None else jnp.dtype(out_dtype)
        nbytes = logits.dtype.itemsize + jnp.dtype(out_dt).itemsize
        tb_ = tb if tb is not None else _choose_tb(B, C, nbytes, budget)
        return _row_call(_softmax_kernel, out_dt, tb_, vmem_limit, logits)
    else:
        return _sample_onehot(key)


# ---------------------------------------------------------------------------
# Demo / self-check
# ---------------------------------------------------------------------------
if __name__ == "__main__":
    key = jax.random.PRNGKey(0)
    k_logits, k_g1, k_g2, k_g3, k_g4 = jax.random.split(key, 5)

    B, C = 32, 16  # (batch, num_classes)
    logits = jax.random.normal(k_logits, (B, C), dtype=jnp.float32)

    # Branch 1: training=True, temperature=None -> softmax over class axis.
    out_softmax = jax.block_until_ready(
        categorical_activation(logits, training=True, temperature=None))
    ref_softmax = jax.nn.softmax(logits, axis=-1)
    assert out_softmax.shape == (B, C)
    assert float(jnp.max(jnp.abs(out_softmax - ref_softmax))) < 1e-5, "softmax mismatch"

    # Branch 2a: temperature set, training=True -> soft gumbel-softmax.
    out_gs_soft = jax.block_until_ready(
        categorical_activation(logits, training=True, temperature=0.5, key=k_g1))
    assert bool(jnp.all(jnp.isfinite(out_gs_soft)))
    assert bool(jnp.all(out_gs_soft >= 0.0)) and bool(jnp.all(out_gs_soft <= 1.0 + 1e-5))
    assert bool(jnp.all(jnp.abs(jnp.sum(out_gs_soft, axis=-1) - 1.0) < 1e-3)), \
        "soft gumbel-softmax rows do not sum to 1"

    # Branch 2b: temperature set, training=False -> hard one-hot forward.
    out_gs_hard = jax.block_until_ready(
        categorical_activation(logits, training=False, temperature=0.5, key=k_g2))
    ohf = out_gs_hard.astype(jnp.float32)
    assert bool(jnp.all(jnp.sum(ohf, axis=-1) == 1.0)), "hard gs not one-hot"
    assert bool(jnp.all((ohf == 0.0) | (ohf == 1.0)))

    # Branch 3: temperature=None, training=False -> OneHotCategorical sample.
    out_sample = jax.block_until_ready(
        categorical_activation(logits, training=False, temperature=None, key=k_g3))
    osf = out_sample.astype(jnp.float32)
    assert bool(jnp.all(jnp.sum(osf, axis=-1) == 1.0)), "sample not one-hot"
    assert bool(jnp.all((osf == 0.0) | (osf == 1.0)))

    # Determinism: same key -> same sample.
    out_sample2 = jax.block_until_ready(
        categorical_activation(logits, training=False, temperature=None, key=k_g3))
    assert bool(jnp.all(out_sample == out_sample2)), "sampling not deterministic per key"

    # Sanity: with extremely peaked logits the sample must hit the peaked class.
    peak_cls = jnp.arange(B, dtype=jnp.int32) % C
    logits_peak = (jax.nn.one_hot(peak_cls, C, dtype=jnp.float32) * 30.0)
    out_peak = jax.block_until_ready(
        categorical_activation(logits_peak, training=False, temperature=None, key=k_g4))
    assert bool(jnp.all(jnp.argmax(out_peak.astype(jnp.float32), axis=-1) == peak_cls)), \
        "peaked-logits sample mismatch"

    # bf16 logits path (no wrapper upcast): shape/dtype preserved, rows ~sum to 1.
    logits_bf16 = logits.astype(jnp.bfloat16)
    out_bf16 = jax.block_until_ready(
        categorical_activation(logits_bf16, training=True, temperature=None))
    assert out_bf16.dtype == jnp.bfloat16 and out_bf16.shape == (B, C)
    assert bool(jnp.all(jnp.abs(jnp.sum(out_bf16.astype(jnp.float32), axis=-1) - 1.0)
                        < 5e-2))

    print("KERNEL_OK")
</pallas_src>

<mosaic_0001>
module attributes {stable_mosaic.version = 11 : i64} {
  func.func @_softmax_kernel(%arg0: i32, %arg1: memref<8x16xf32, #tpu.memory_space<vmem>>, %arg2: memref<8x16xf32, #tpu.memory_space<vmem>>) attributes {dimension_semantics = [#tpu.dimension_semantics<parallel>], iteration_bounds = array<i64: 4>, scalar_prefetch = 0 : i64, scratch_operands = 0 : i64, tpu.core_type = #tpu.core_type<tc>, window_params = [{transform_indices = @transform_0, window_bounds = array<i64: 8, 16>}, {transform_indices = @transform_1, window_bounds = array<i64: 8, 16>}]} {
    %c0 = arith.constant 0 : index
    %c0_0 = arith.constant 0 : index
    %0 = vector.load %arg1[%c0, %c0_0] : memref<8x16xf32, #tpu.memory_space<vmem>>, vector<8x16xf32>
    %cst = arith.constant dense<0xFF800000> : vector<8xf32>
    %1 = vector.multi_reduction <maximumf>, %0, %cst [1] : vector<8x16xf32> to vector<8xf32>
    %2 = vector.shape_cast %1 : vector<8xf32> to vector<8x1xf32>
    %3 = vector.broadcast %2 : vector<8x1xf32> to vector<8x16xf32>
    %4 = arith.subf %0, %3 : vector<8x16xf32>
    %5 = math.exp %4 : vector<8x16xf32>
    %cst_1 = arith.constant dense<0.000000e+00> : vector<8xf32>
    %6 = vector.multi_reduction <add>, %5, %cst_1 [1] : vector<8x16xf32> to vector<8xf32>
    %7 = vector.shape_cast %6 : vector<8xf32> to vector<8x1xf32>
    %8 = vector.broadcast %7 : vector<8x1xf32> to vector<8x16xf32>
    %9 = arith.divf %5, %8 : vector<8x16xf32>
    %c0_2 = arith.constant 0 : index
    %c0_3 = arith.constant 0 : index
    %10 = vector.load %arg2[%c0_2, %c0_3] : memref<8x16xf32, #tpu.memory_space<vmem>>, vector<8x16xf32>
    tpu.vector_store %arg2[%c0_2, %c0_3], %9 {strides = array<i32>} : memref<8x16xf32, #tpu.memory_space<vmem>>, vector<8x16xf32>,
    return
  }
  func.func @transform_0(%arg0: i32) -> (i32, i32) {
    %c0_i32 = arith.constant 0 : i32
    %c0_i32_0 = arith.constant 0 : i32
    return %arg0, %c0_i32 : i32, i32
  }
  func.func @transform_1(%arg0: i32) -> (i32, i32) {
    %c0_i32 = arith.constant 0 : i32
    %c0_i32_0 = arith.constant 0 : i32
    return %arg0, %c0_i32 : i32, i32
  }
}

</mosaic_0001>

<bundles_post_ra>
// kernel: tpu_custom_call.1
= control target key start
LH: loop header
LB: loop body
LE: loop exit
PB: predicated region body
PF: predicated region fallthrough
CT: control target
= control target key end

     0   :  { %s218_s6 = smov 0   ;;  %s238_s0 = inlined_call_operand.vmem [shape: f32[32,16], index: 0, kind: input, shape index: {}]   ;;  %s239_s1 = inlined_call_operand.vmem [shape: f32[32,16], index: 1, kind: output, shape index: {}]  }
   0x1 LB: > { %s179_s7 = sadd.s32 4294967295, %s206_s6   ;;  %p183_p0 = scmp.ge.s32.totalorder %s206_s6, 1  ;;  %s206_s6 = sphi %s218_s6, %s11_s6  }
   0x2   : > { %p86_p1 = scmp.lt.s32.totalorder %s206_s6, 5 }
   0x4   : > { %p87_p2 = pnand %p183_p0, %p86_p1 }
   0x5   : > { %p104_p3 = scmp.lt.s32.totalorder (!%p87_p2), %s179_s7, 3 }
   0x6   : > { %90 = sbr.rel (%p87_p2) target bundleno = 328 (0x148), region = 24 }
   0xb   : > { %s241_s7 = smov (!%p104_p3, %s179_s7), 3  ;;  %vm113_vm0 = vcmask 130048  }
   0xc   : > { %s184_s8 = sshll.u32 %s241_s7, 3 }
   0xd   : > { %s107_s11 = scalar_lea.vmem %s238_s0, %s184_s8  ;;  %s111_s14 = scalar_lea.vmem %s239_s1, %s184_s8 }
   0xe   : > { %v112_v0 = vld [vmem:[%s107_s11] sm:$0xff] }
   0xf   : > { %v114_v1 = vsel %vm113_vm0, %v112_v0, -inf }
  0x10   : > { %115 = vmax.xlane.f32.xlu0 %v114_v1 }
  0x99   : > { %v116_v2 = vpop.xlane.xlu0 %115 }
  0x9a   : > { %v117_v3 = vsub.f32 %v112_v0, %v116_v2 }
  0x9c   : > { %v118_v4 = vmul.f32 1.442695, %v117_v3 }
  0x9e   : > { %196 = vpow2.f32 %v118_v4 }
  0xab   : > { %v197_v5 = vpop.eup %196 }
  0xac   : > { %v120_v6 = vsel %vm113_vm0, %v197_v5, 0.0 }
  0xad   : > { %121 = vadd.xlane.f32.xlu0 %v120_v6 }
 0x136   : > { %v122_v7 = vpop.xlane.xlu0 %121 }
 0x137   : > { %198 = vrcp.f32 %v122_v7 }
 0x144   : > { %v199_v8 = vpop.eup %198 }
 0x145   : > { %v124_v9 = vmul.f32 %v199_v8, %v197_v5 }
 0x147   : > { %125 = vst.msk [vmem:[%s111_s14] sm:$0xff] %vm113_vm0, %v124_v9 }
 0x148 PF: > { %s11_s6 = sadd.s32 1, %s206_s6  }
 0x149   : > { %p8_p4 = scmp.ge.s32.totalorder %s11_s6, 6  }
 0x14b   :  { %10 = sbr.rel (!%p8_p4) target bundleno = 1 (0x1), region = 54 }

</bundles_post_ra>
